<compile_context>
chip_gen: v7x
topology: tpu7x:2x2x1
jax: 0.10.0
libtpu: 0.0.40
codegen_flags: <defaults>
</compile_context>

<pallas_src>
import functools

import jax
import jax.numpy as jnp
from jax import lax
from jax.experimental import pallas as pl
from jax.experimental.pallas import tpu as pltpu

_ROWS_PER_STORE = 8  # one (8, E) output slab per aligned store


def _round_up(x, m):
    return ((x + m - 1) // m) * m


def _vmem_capacity_bytes():
    """Physical VMEM per TensorCore; conservative fallback if query fails."""
    try:
        return int(pltpu.get_tpu_info().vmem_capacity_bytes)
    except Exception:
        return 64 * 1024 * 1024  # v7x-sized conservative default


def _gather_kernel(ids_ref, w_ref, o_ref, *, block_rows):
    """Gather `block_rows` rows of the VMEM-resident table into one dense block.

    ids_ref : SMEM int32[(N_pad,)]   (scalar-prefetched ids, flat)
    w_ref   : VMEM f32[(V, E)]       (full table, resident across grid steps)
    o_ref   : VMEM f32[(block_rows, E)]
    """
    base = pl.program_id(0) * block_rows

    def slab_body(s, carry):
        start = base + s * _ROWS_PER_STORE
        # Gather 8 rows (dynamic-sublane loads from the resident table) ...
        rows = [
            w_ref[pl.ds(ids_ref[start + k], 1), :] for k in range(_ROWS_PER_STORE)
        ]
        slab = jnp.concatenate(rows, axis=0)  # (8, E)
        # ... and write them back as one aligned, unmasked (8, E) tile store.
        off = pl.multiple_of(s * _ROWS_PER_STORE, _ROWS_PER_STORE)
        o_ref[pl.ds(off, _ROWS_PER_STORE), :] = slab
        return carry

    lax.fori_loop(0, block_rows // _ROWS_PER_STORE, slab_body, 0)


def embedding_lookup(weight, ids, *, block_rows=512, min_rows_for_kernel=64):
    """Pallas gather: returns weight[ids] with ids flattened to a vector."""
    V, E = weight.shape
    ids_flat = jnp.asarray(ids, dtype=jnp.int32).reshape(-1)
    N = int(ids_flat.shape[0])
    if N == 0:
        return jnp.zeros((0, E), weight.dtype)

    # PyTorch would raise on out-of-range ids; we clamp so no OOB DMA/vld can occur.
    ids_flat = jnp.clip(ids_flat, 0, V - 1)

    itemsize = jnp.dtype(weight.dtype).itemsize
    table_bytes = V * E * itemsize

    # Chunk of ids handled per grid step (multiple of 8 for dense output tiles).
    B = max(_ROWS_PER_STORE, (int(block_rows) // _ROWS_PER_STORE) * _ROWS_PER_STORE)
    B = min(B, _round_up(N, _ROWS_PER_STORE))
    G = pl.cdiv(N, B)
    N_pad = G * B

    # VMEM budget: resident table + double-buffered output block + headroom.
    vmem_cap = _vmem_capacity_bytes()
    need_bytes = table_bytes + 2 * B * E * itemsize + (1 << 20)

    if N < min_rows_for_kernel or need_bytes > int(0.75 * vmem_cap):
        # Small lookups don't amortize kernel launch; huge tables don't fit VMEM.
        # TODO(synk): manual double-buffered HBM row-DMA gather for tables > VMEM.
        return jnp.take(weight, ids_flat, axis=0)

    ids_pad = jnp.zeros((N_pad,), jnp.int32).at[:N].set(ids_flat)

    compiler_kwargs = dict(dimension_semantics=("parallel",))
    if need_bytes > 12 * 1024 * 1024:
        # Raise the scoped VMEM limit (v5e default 16 MiB, v6e/v7x 32 MiB).
        compiler_kwargs["vmem_limit_bytes"] = int(
            min(need_bytes + (4 << 20), int(0.9 * vmem_cap))
        )

    cost = pl.CostEstimate(
        flops=0,
        transcendentals=0,
        bytes_accessed=int(table_bytes + N_pad * E * itemsize + N_pad * 4),
    )

    out = pl.pallas_call(
        functools.partial(_gather_kernel, block_rows=B),
        out_shape=jax.ShapeDtypeStruct((N_pad, E), weight.dtype),
        grid_spec=pltpu.PrefetchScalarGridSpec(
            num_scalar_prefetch=1,  # ids land in SMEM before the grid runs
            grid=(G,),
            in_specs=[
                # Full table, constant block index -> DMA'd once, VMEM-resident.
                pl.BlockSpec((V, E), lambda i, ids_ref: (0, 0)),
            ],
            # Dense (B, E) output block per id-chunk.
            out_specs=pl.BlockSpec((B, E), lambda i, ids_ref: (i, 0)),
        ),
        compiler_params=pltpu.CompilerParams(**compiler_kwargs),
        cost_estimate=cost,
    )(ids_pad, weight)

    return out[:N]


class EntityEmbeddingModel:
    """JAX/Pallas re-implementation of the PyTorch EntityEmbeddingModel."""

    def __init__(self, entity_info, embed_size, init_embed=None,
                 diversity_scores=None, key=None):
        self.entity_info = entity_info
        self.embed_size = embed_size
        self.diversity_scores = diversity_scores
        if key is None:
            key = jax.random.PRNGKey(0)
        initrange = 0.5 / embed_size
        self.weights = {}
        for i, name in enumerate(entity_info):
            vsz = entity_info[name]["vocab_size"] + 1
            k = jax.random.fold_in(key, i)
            # Matches torch: FloatTensor(vocab+1, E).uniform_(-initrange, initrange).
            # (The padding_idx row is overwritten by this custom init in the
            # reference module too, so no zeroing is applied.)
            w = jax.random.uniform(k, (vsz, embed_size), jnp.float32,
                                   minval=-initrange, maxval=initrange)
            self.weights[name] = w
        if init_embed is not None:
            for name in entity_info:
                self.weights[name] = jnp.asarray(init_embed[name], jnp.float32)

    def forward(self, entity, ids=None):
        if ids is None:
            return self.weights[entity]
        ids = jnp.asarray(ids)
        orig_shape = ids.shape
        flat = embedding_lookup(self.weights[entity], ids.reshape(-1))
        return flat.reshape(*orig_shape, self.embed_size)

    def vocab_size(self, entity):
        return self.entity_info[entity]["vocab_size"] + 1


if __name__ == "__main__":
    key = jax.random.PRNGKey(0)

    entity_info = {
        "user": {"vocab_size": 100},
        "item": {"vocab_size": 40},
    }
    embed_size = 128  # lane-aligned embedding width

    model = EntityEmbeddingModel(entity_info, embed_size, key=key)

    # Large-ish lookup -> Pallas resident-table gather kernel (grid of 2 chunks).
    k_ids = jax.random.fold_in(key, 123)
    ids_big = jax.random.randint(
        k_ids, (8, 128), 0, entity_info["user"]["vocab_size"] + 1, dtype=jnp.int32)
    out_big = jax.block_until_ready(model.forward("user", ids_big))
    ref_big = model.weights["user"][ids_big.reshape(-1)].reshape(8, 128, embed_size)

    # Tiny lookup -> falls back to XLA gather (kernel not worth launching).
    k_ids2 = jax.random.fold_in(key, 456)
    ids_small = jax.random.randint(
        k_ids2, (2, 8), 0, entity_info["item"]["vocab_size"] + 1, dtype=jnp.int32)
    out_small = jax.block_until_ready(model.forward("item", ids_small))
    ref_small = model.weights["item"][ids_small.reshape(-1)].reshape(2, 8, embed_size)

    # forward without ids -> full weight table (pure parameter access).
    full = jax.block_until_ready(model.forward("item"))

    assert out_big.shape == (8, 128, embed_size)
    assert out_small.shape == (2, 8, embed_size)
    assert full.shape == (entity_info["item"]["vocab_size"] + 1, embed_size)
    assert jnp.allclose(out_big, ref_big)
    assert jnp.allclose(out_small, ref_small)

    print("KERNEL_OK")
</pallas_src>

<mosaic_0001>
module attributes {stable_mosaic.version = 11 : i64} {
  func.func @_gather_kernel(%arg0: i32, %arg1: memref<1024xi32, #tpu.memory_space<smem>>, %arg2: memref<101x128xf32, #tpu.memory_space<vmem>>, %arg3: memref<512x128xf32, #tpu.memory_space<vmem>>) attributes {dimension_semantics = [#tpu.dimension_semantics<parallel>], iteration_bounds = array<i64: 2>, scalar_prefetch = 1 : i64, scratch_operands = 0 : i64, tpu.core_type = #tpu.core_type<tc>, window_params = [{pipeline_mode = #tpu.pipeline_mode<synchronous>, transform_indices = @transform_0, window_bounds = array<i64: 101, 128>}, {transform_indices = @transform_1, window_bounds = array<i64: 512, 128>}]} {
    %c512_i32 = arith.constant 512 : i32
    %0 = arith.muli %arg0, %c512_i32 : i32
    %c0_i32 = arith.constant 0 : i32
    %c64_i32 = arith.constant 64 : i32
    %1 = arith.addi %c0_i32, %c64_i32 : i32
    %c1_i32 = arith.constant 1 : i32
    scf.for %arg4 = %c0_i32 to %1 step %c1_i32  : i32 {
      %c8_i32 = arith.constant 8 : i32
      %2 = arith.muli %arg4, %c8_i32 : i32
      %3 = arith.addi %0, %2 : i32
      %c0_i32_1 = arith.constant 0 : i32
      %4 = arith.addi %3, %c0_i32_1 : i32
      %5 = arith.index_cast %4 : i32 to index
      %6 = memref.load %arg1[%5] : memref<1024xi32, #tpu.memory_space<smem>>
      %7 = arith.index_cast %6 : i32 to index
      %c0 = arith.constant 0 : index
      %8 = vector.load %arg2[%7, %c0] : memref<101x128xf32, #tpu.memory_space<vmem>>, vector<1x128xf32>
      %c1_i32_2 = arith.constant 1 : i32
      %9 = arith.addi %3, %c1_i32_2 : i32
      %10 = arith.index_cast %9 : i32 to index
      %11 = memref.load %arg1[%10] : memref<1024xi32, #tpu.memory_space<smem>>
      %12 = arith.index_cast %11 : i32 to index
      %c0_3 = arith.constant 0 : index
      %13 = vector.load %arg2[%12, %c0_3] : memref<101x128xf32, #tpu.memory_space<vmem>>, vector<1x128xf32>
      %c2_i32 = arith.constant 2 : i32
      %14 = arith.addi %3, %c2_i32 : i32
      %15 = arith.index_cast %14 : i32 to index
      %16 = memref.load %arg1[%15] : memref<1024xi32, #tpu.memory_space<smem>>
      %17 = arith.index_cast %16 : i32 to index
      %c0_4 = arith.constant 0 : index
      %18 = vector.load %arg2[%17, %c0_4] : memref<101x128xf32, #tpu.memory_space<vmem>>, vector<1x128xf32>
      %c3_i32 = arith.constant 3 : i32
      %19 = arith.addi %3, %c3_i32 : i32
      %20 = arith.index_cast %19 : i32 to index
      %21 = memref.load %arg1[%20] : memref<1024xi32, #tpu.memory_space<smem>>
      %22 = arith.index_cast %21 : i32 to index
      %c0_5 = arith.constant 0 : index
      %23 = vector.load %arg2[%22, %c0_5] : memref<101x128xf32, #tpu.memory_space<vmem>>, vector<1x128xf32>
      %c4_i32 = arith.constant 4 : i32
      %24 = arith.addi %3, %c4_i32 : i32
      %25 = arith.index_cast %24 : i32 to index
      %26 = memref.load %arg1[%25] : memref<1024xi32, #tpu.memory_space<smem>>
      %27 = arith.index_cast %26 : i32 to index
      %c0_6 = arith.constant 0 : index
      %28 = vector.load %arg2[%27, %c0_6] : memref<101x128xf32, #tpu.memory_space<vmem>>, vector<1x128xf32>
      %c5_i32 = arith.constant 5 : i32
      %29 = arith.addi %3, %c5_i32 : i32
      %30 = arith.index_cast %29 : i32 to index
      %31 = memref.load %arg1[%30] : memref<1024xi32, #tpu.memory_space<smem>>
      %32 = arith.index_cast %31 : i32 to index
      %c0_7 = arith.constant 0 : index
      %33 = vector.load %arg2[%32, %c0_7] : memref<101x128xf32, #tpu.memory_space<vmem>>, vector<1x128xf32>
      %c6_i32 = arith.constant 6 : i32
      %34 = arith.addi %3, %c6_i32 : i32
      %35 = arith.index_cast %34 : i32 to index
      %36 = memref.load %arg1[%35] : memref<1024xi32, #tpu.memory_space<smem>>
      %37 = arith.index_cast %36 : i32 to index
      %c0_8 = arith.constant 0 : index
      %38 = vector.load %arg2[%37, %c0_8] : memref<101x128xf32, #tpu.memory_space<vmem>>, vector<1x128xf32>
      %c7_i32 = arith.constant 7 : i32
      %39 = arith.addi %3, %c7_i32 : i32
      %40 = arith.index_cast %39 : i32 to index
      %41 = memref.load %arg1[%40] : memref<1024xi32, #tpu.memory_space<smem>>
      %42 = arith.index_cast %41 : i32 to index
      %c0_9 = arith.constant 0 : index
      %43 = vector.load %arg2[%42, %c0_9] : memref<101x128xf32, #tpu.memory_space<vmem>>, vector<1x128xf32>
      %44 = tpu.concatenate %8, %13, %18, %23, %28, %33, %38, %43 in 0 : vector<1x128xf32>, vector<1x128xf32>, vector<1x128xf32>, vector<1x128xf32>, vector<1x128xf32>, vector<1x128xf32>, vector<1x128xf32>, vector<1x128xf32> -> vector<8x128xf32>
      %c8_i32_10 = arith.constant 8 : i32
      %45 = arith.muli %arg4, %c8_i32_10 : i32
      %46 = tpu.assume_multiple %45, 8 : i32
      %47 = arith.index_cast %46 : i32 to index
      %c0_11 = arith.constant 0 : index
      %48 = vector.load %arg3[%47, %c0_11] : memref<512x128xf32, #tpu.memory_space<vmem>>, vector<8x128xf32>
      tpu.vector_store %arg3[%47, %c0_11], %44 {strides = array<i32>} : memref<512x128xf32, #tpu.memory_space<vmem>>, vector<8x128xf32>,
    }
    %c64_i32_0 = arith.constant 64 : i32
    return
  }
  func.func @transform_0(%arg0: i32, %arg1: memref<1024xi32, #tpu.memory_space<smem>>) -> (i32, i32) {
    %c0_i32 = arith.constant 0 : i32
    %c0_i32_0 = arith.constant 0 : i32
    %c0_i32_1 = arith.constant 0 : i32
    return %c0_i32, %c0_i32_0 : i32, i32
  }
  func.func @transform_1(%arg0: i32, %arg1: memref<1024xi32, #tpu.memory_space<smem>>) -> (i32, i32) {
    %c0_i32 = arith.constant 0 : i32
    %c0_i32_0 = arith.constant 0 : i32
    return %arg0, %c0_i32 : i32, i32
  }
}

</mosaic_0001>

<bundles_post_ra>
// kernel: tpu_custom_call.1
= control target key start
LH: loop header
LB: loop body
LE: loop exit
PB: predicated region body
PF: predicated region fallthrough
CT: control target
= control target key end

     0   :  { %s672_s0 = inlined_call_operand.hbm [shape: s32[1024], index: 0, kind: input, shape index: {}]   ;;  %s673_s1 = inlined_call_operand.hbm [shape: f32[101,128], index: 1, kind: input, shape index: {}]   ;;  %s674_s2 = inlined_call_operand.hbm [shape: f32[1024,128], index: 2, kind: output, shape index: {}]  }
   0x1   :  { %680 = sst [smem:[#allocation11_spill]] %s673_s1  ;;  %s361_s11 = scalar_lea.hbm %s672_s0, 128 }
   0x2   :  { %p362_p0 = scmp.ne.s32.totalorder %s672_s0, %s361_s11  ;;  %p365_p1 = scmp.lt.u32.totalorder %s361_s11, %s672_s0 }
   0x4   :  { %p367_p2 = pnand %p365_p1, %p362_p0 }
   0x6   :  { %370 = shalt.err (!%p367_p2)  }
   0x7   :  { %s477_s16 = smov [#allocation3]  }
   0x8   :  { %8 = dma.hbm_to_smem %s672_s0, 128, %s477_s16, [#allocation2] }
   0x9   :  { %447 = dma.done.wait [#allocation2], 128 }
   0xa   :  { %448 = vsyncadd [#allocation2], 4294967168 }
   0xb   :  { %10 = sfence }
   0xc   :  { %11 = vsyncpa [#allocation5], 0 }
   0xd   :  { %12 = vsyncpa [#allocation6], 0 }
   0xe   :  { %14 = vsyncpa [#allocation6 + $0x1], 0  ;;  %s511_s19 = smov 0   ;;  %s513_s20 = smov 0  }
   0xf   :  { %s515_s21 = smov 0   ;;  %s517_s22 = smov 0  }
  0x10 LB: > { %s532_s0 = sadd.s32 4294967295, %s471_s22   ;;  %s284_s23 = sadd.s32 4294967294, %s471_s22   ;;  %s471_s22 = sphi %s517_s22, %s699_s22   ;;  %s467_s21 = sphi %s515_s21, %s698_s21   ;;  %s463_s20 = sphi %s513_s20, %s697_s20   ;;  %s459_s19 = sphi %s511_s19, %s696_s19  }
  0x11   : > { %s536_s24 = sadd.s32 1, %s471_s22   ;;  %s48_s25 = sadd.s32 1, %s467_s21 }
  0x12   : > { %s45_s26 = ssub.s32 %s471_s22, %s536_s24  ;;  %p58_p3 = scmp.ne.s32.totalorder %s467_s21, %s463_s20 }
  0x13   : > { %p46_p4 = scmp.eq.s32.totalorder %s45_s26, 0  ;;  %p59_p5 = scmp.eq.s32.totalorder %s532_s0, 1 }
  0x14   : > { %p64_p6 = scmp.ne.s32.totalorder %s463_s20, %s459_s19  ;;  %p65_p7 = scmp.eq.s32.totalorder %s284_s23, 1 }
  0x15   : > { %s547_s27 = scalar_select %p46_p4, %s467_s21, %s48_s25  }
  0x16   : > { %p549_p8 = por %p59_p5, %p58_p3  ;;  %p553_p9 = por %p65_p7, %p64_p6 }
  0x17   : > { %p285_p10 = scmp.ge.s32.totalorder %s471_s22, 1  ;;  %p72_p11 = scmp.lt.s32.totalorder %s471_s22, 3 }
  0x18   : > { %s681_s28 = scalar_select %p549_p8, 1, 0 }
  0x19   : > { %s682_s29 = scalar_select %p553_p9, 1, 0 }
  0x1a   : > { %p675_p12 = scmp.eq.s32.totalorder %s532_s0, 0  ;;  %p560_p13 = pnand %p285_p10, %p72_p11 }
  0x1b   : > { %s478_s3 = smov [#allocation4]   ;;  %s685_s1 = sld [smem:[#allocation11_spill]] }
  0x1c   : > { %s683_s30 = scalar_select %p560_p13, 1, 0 }
  0x1d   : > { %s84_s4 = sshll.u32 %s478_s3, 4  ;;  %p304_p0 = pneg %p560_p13  ;;  %s85_s4 = int_to_ptr.vmem [resolvable:$true] %s84_s4 }
  0x1f   : > { %p568_p1 = pnand %p675_p12, %p304_p0 }
  0x21   : > { %s371_s8 = scalar_lea.hbm %s685_s1, 1664  ;;  %p373_p3 = pneg %p568_p1 }
  0x22   : > { %p372_p2 = scmp.ne.s32.totalorder %s685_s1, %s371_s8  ;;  %p378_p6 = scmp.lt.u32.totalorder %s371_s8, %s685_s1 }
  0x24   : > { %p374_p4 = pnand %p373_p3, %p372_p2 }
  0x26   : > { %p375_p5 = pneg %p374_p4 }
  0x28   : > { %p380_p7 = pnand %p378_p6, %p375_p5 }
  0x2a   : > { %383 = shalt.err (!%p380_p7)
}
  0x2b   : > { %s384_s13 = scalar_lea.vmem %s85_s4, 1664  ;;  %p392_p12 = scmp.lt.s32.totalorder %s85_s4, %s85_s4 }
  0x2c   : > { %p385_p10 = scmp.ne.s32.totalorder %s85_s4, %s384_s13  ;;  %p393_p9 = scmp.lt.s32.totalorder %s384_s13, %s384_s13 }
  0x2e   : > { %p387_p11 = pnand %p385_p10, %p373_p3  ;;  %p394_p8 = por %p393_p9, %p392_p12 }
  0x30   : > { %p388_p0 = pneg %p387_p11 }
  0x32   : > { %p395_p13 = pnand %p394_p8, %p388_p0 }
  0x34   : > { %398 = shalt.err (!%p395_p13)
}
  0x35   : > { %s479_s14 = smov 128   ;;  %s480_s15 = smov 8  }
  0x36   : > { %307 = dma.hbm_to_vmem [thread:$0]  (!%p568_p1), %s685_s1, 1664, %s85_s4, [#allocation5], %s479_s14, %s479_s14, %s480_s15  }
  0x37   : > { %p686_p2 = scmp.ne.s32.totalorder %s683_s30, 0 }
  0x38   : > { %p687_p4 = scmp.eq.s32.totalorder (!%p686_p2), %s532_s0, 0 }
  0x39   : > { %100 = sbr.rel (%p686_p2) target bundleno = 111 (0x6f), region = 24 }
  0x40   : > { %450 = dma.done.wait (%p687_p4), [#allocation5], 1664   ;;  %p688_p3 = pmov %p687_p4 }
  0x41   : > { %s678_s18 = sand.u32 1, %s463_s20   ;;  %s601_s3 = smov 0  }
  0x42   : > { %452 = vsyncadd (%p688_p3), [#allocation5], 4294965632  ;;  %s598_s25 = sshll.u32 %s678_s18, 9 }
  0x43 LB: >> { %s679_s30 = sshll.u32 %s475_s3, 3  ;;  %s689_s23 = sshll.u32 %s532_s0, 9  ;;  %vm177_vm0 = vcmask 1040384   ;;  %vm179_vm1 = vcmask 1041408   ;;  %vm181_vm2 = vcmask 1042432   ;;  %vm183_vm3 = vcmask 1043456   ;;  %s475_s3 = sphi %s601_s3, %s122_s3  }
  0x44   : >> { %s124_s4 = sadd.s32 %s679_s30, %s689_s23  ;;  %vm185_vm4 = vcmask 1044480   ;;  %vm187_vm5 = vcmask 1045504   ;;  %vm189_vm6 = vcmask 1046528  }
  0x45   : >> { %s125_s5 = sld [smem:[#allocation3 + %s124_s4]]  ;;  %s128_s6 = sadd.s32 1, %s124_s4 }
  0x46   : >> { %s129_s7 = sld [smem:[#allocation3 + %s128_s6]]  ;;  %s132_s8 = sadd.s32 2, %s124_s4 }
  0x47   : >> { %s133_s9 = sld [smem:[#allocation3 + %s132_s8]]  ;;  %s136_s10 = sadd.s32 3, %s124_s4 }
  0x48   : >> { %s137_s11 = sld [smem:[#allocation3 + %s136_s10]]  ;;  %s140_s12 = sadd.s32 4, %s124_s4 }
  0x49   : >> { %s141_s13 = sld [smem:[#allocation3 + %s140_s12]]  ;;  %s144_s14 = sadd.s32 5, %s124_s4 }
  0x4a   : >> { %s145_s15 = sld [smem:[#allocation3 + %s144_s14]]  ;;  %s148_s16 = sadd.s32 6, %s124_s4 }
  0x4b   : >> { %s149_s17 = sld [smem:[#allocation3 + %s148_s16]]  ;;  %s152_s18 = sadd.s32 7, %s124_s4 }
  0x4c   : >> { %s126_s26 = scalar_lea.vmem [#allocation4], %s125_s5  ;;  %s130_s1 = scalar_lea.vmem [#allocation4], %s129_s7 }
  0x4d   : >> { %v127_v0 = vld [vmem:[%s126_s26] sm:$0x1]  ;;  %s153_s23 = sld [smem:[#allocation3 + %s152_s18]]  ;;  %s134_s30 = scalar_lea.vmem [#allocation4], %s133_s9 }
  0x4e   : >> { %v131_v1 = vld [vmem:[%s130_s1] sm:$0x1]  ;;  %s138_s6 = scalar_lea.vmem [#allocation4], %s137_s11  ;;  %s690_s26 = sshll.u32 %s475_s3, 3 }
  0x4f   : >> { %v135_v2 = vld [vmem:[%s134_s30] sm:$0x1]  ;;  %v157_v3 = vrot.slane %v131_v1, 7  ;;  %s142_s8 = scalar_lea.vmem [#allocation4], %s141_s13  ;;  %s691_s30 = scalar_lea.vmem [#allocation7], %s598_s25 }
  0x50   : >> { %v139_v4 = vld [vmem:[%s138_s6] sm:$0x1]  ;;  %v160_v5 = vrot.slane %v135_v2, 6  ;;  %s146_s4 = scalar_lea.vmem [#allocation4], %s145_s15  ;;  %s191_s5 = scalar_lea.vmem %s691_s30, %s690_s26 [#allocation7] }
  0x51   : >> { %v143_v6 = vld [vmem:[%s142_s8] sm:$0x1]  ;;  %v163_v7 = vrot.slane %v139_v4, 5  ;;  %v178_v8 = vsel %vm177_vm0, %v127_v0, %v157_v3  ;;  %s150_s1 = scalar_lea.vmem [#allocation4], %s149_s17  ;;  %s122_s3 = sadd.s32 1, %s475_s3  }
  0x52   : >> { %v147_v9 = vld [vmem:[%s146_s4] sm:$0x1]  ;;  %v166_v10 = vrot.slane %v143_v6, 4  ;;  %v180_v11 = vsel %vm179_vm1, %v178_v8, %v160_v5  ;;  %p119_p8 = scmp.ge.s32.totalorder %s122_s3, 64  }
  0x53   : >> { %v151_v12 = vld [vmem:[%s150_s1] sm:$0x1]  ;;  %v169_v13 = vrot.slane %v147_v9, 3  ;;  %v182_v14 = vsel %vm181_vm2, %v180_v11, %v163_v7  ;;  %s154_s18 = scalar_lea.vmem [#allocation4], %s153_s23  ;;  %s297_s23 = sshll.u32 (%p119_p8), %s532_s0, 13 }
  0x54   : >> { %v172_v15 = vrot.slane %v151_v12, 2  ;;  %v184_v16 = vsel %vm183_vm3, %v182_v14, %v166_v10  ;;  %v155_v17 = vld [vmem:[%s154_s18] sm:$0x1]  ;;  %121 = sbr.rel (!%p119_p8) target bundleno = 67 (0x43), region = 77  ;;  %s623_s10 = scalar_lea.hbm (%p119_p8), %s674_s2, %s297_s23 }
  0x55   : >> { %v186_v18 = vsel %vm185_vm4, %v184_v16, %v169_v13  ;;  %v175_v19 = vrot.slane %v155_v17, 1  ;;  %s692_s11 = scalar_lea.vmem (%p119_p8), [#allocation7], %s598_s25  ;;  %s693_s13 = sand.u32 (%p119_p8), 1, %s463_s20  }
  0x56   : >> { %v188_v20 = vsel %vm187_vm5, %v186_v18, %v172_v15  ;;  %s207_s12 = sshll.u32 (%p119_p8), %s692_s11, 4  ;;  %s631_s3 = scalar_lea.sflag (%p119_p8), [#allocation6], %s693_s13  ;;  %s627_s12 = int_to_ptr.vmem [resolvable:$true] %s207_s12 }
  0x57   : >> { %v190_v21 = vsel %vm189_vm6, %v188_v20, %v175_v19  ;;  %s399_s14 = scalar_lea.vmem (%p119_p8), %s627_s12, 8192  ;;  %p694_p12 = scmp.ne.s32.totalorder (%p119_p8), %s681_s28, 0 }
  0x58   : >> { %192 = vst [vmem:[%s191_s5] sm:$0xff] %v190_v21  ;;  %p400_p9 = scmp.ne.s32.totalorder (%p119_p8), %s627_s12, %s399_s14  ;;  %s481_s0 = smov (%p119_p8), [#allocation7]  }
  0x59   : > { %s403_s15 = sshll.u32 (%p119_p8), %s481_s0, 4  ;;  %s404_s15 = int_to_ptr.vmem [resolvable:$false] %s403_s15 }
  0x5a   : > { %p401_p13 = pnand (%p119_p8), %p400_p9, %p694_p12  ;;  %s405_s16 = scalar_lea.vmem (%p119_p8), %s404_s15, 16384 }
  0x5b   : > { %p406_p5 = scmp.lt.s32.totalorder %s627_s12, %s404_s15  ;;  %p407_p6 = scmp.lt.s32.totalorder %s405_s16, %s399_s14 }
  0x5c   : > { %p402_p1 = pneg %p401_p13 }
  0x5d   : > { %p408_p7 = por %p407_p6, %p406_p5 }
  0x5f   : > { %p409_p10 = pnand %p408_p7, %p402_p1 }
  0x61   : > { %412 = shalt.err (!%p409_p10)
}
  0x62   : > { %s413_s25 = scalar_lea.hbm %s623_s10, 8192  ;;  %s417_s8 = scalar_lea.hbm %s674_s2, 16384 }
  0x63   : > { %p414_p11 = scmp.ne.s32.totalorder %s623_s10, %s413_s25  ;;  %p418_p4 = scmp.lt.u32.totalorder %s623_s10, %s674_s2 }
  0x64   : > { %p419_p3 = scmp.lt.u32.totalorder %s417_s8, %s413_s25  ;;  %p421_p9 = scmp.lt.u32.totalorder %s413_s25, %s623_s10 }
  0x65   : > { %p415_p0 = pnand %p414_p11, %p694_p12 }
  0x66   : > { %p420_p8 = por %p419_p3, %p418_p4 }
  0x67   : > { %p416_p2 = pneg %p415_p0 }
  0x68   : > { %p422_p13 = por %p421_p9, %p420_p8 }
  0x6a   : > { %p423_p1 = pnand %p422_p13, %p416_p2 }
  0x6c   : > { %426 = shalt.err (!%p423_p1)
}
  0x6d   : > { %s482_s18 = smov 128   ;;  %s483_s26 = smov 8  }
  0x6e   : > { %302 = dma.vmem_to_hbm [thread:$0]  (%p694_p12), %s627_s12, 8192, %s623_s10, %s631_s3, %s482_s18, %s482_s18, %s483_s26  }
  0x6f PF: > { %p314_p5 = scmp.ge.s32.totalorder %s471_s22, 2  ;;  %s222_s30 = sand.u32 1, %s459_s19  }
  0x70   : > { %p695_p6 = scmp.ne.s32.totalorder %s682_s29, 0  ;;  %s223_s5 = scalar_lea.sflag [#allocation6], %s222_s30 }
  0x72   : > { %p309_p7 = pnand %p314_p5, %p695_p6 }
  0x74   : > { %454 = dma.done.wait (!%p309_p7), %s223_s5, 8192  }
  0x75   : > { %456 = vsyncadd (!%p309_p7), %s223_s5, 4294959104  ;;  %p17_p10 = scmp.ge.s32.totalorder %s536_s24, 4   ;;  %s696_s19 = smov %s463_s20 }
  0x76   : > { %s697_s20 = smov %s467_s21  ;;  %s698_s21 = smov %s547_s27 }
  0x77   : > { %s699_s22 = smov %s536_s24  ;;  %19 = sbr.rel (!%p17_p10) target bundleno = 16 (0x10), region = 88 }
  0x7e   :  { %228 = vsyncpa [#allocation5], 1 }
  0x7f   :  { %230 = vsyncpa [#allocation5 + $0x1], 1 }
  0x80   :  { %231 = vsyncpa [#allocation6], 1 }
  0x81   :  { %233 = vsyncpa [#allocation6 + $0x1], 1 }

</bundles_post_ra>
